<compile_context>
chip_gen: v5e
topology: v5e:2x2
jax: 0.10.0
libtpu: 0.0.40
codegen_flags: <defaults>
</compile_context>

<pallas_src>
import functools

import jax
import jax.numpy as jnp
import numpy as np
from jax.experimental import pallas as pl
from jax.experimental.pallas import tpu as pltpu


def _round_up(x, m):
    return (x + m - 1) // m * m


def _render_kernel(depth_ref, delta_ref, sigma_ref, rgb_ref, small_ref, w_ref):
    depth = depth_ref[...]                     # [bn, L] f32
    delta = delta_ref[...]                     # [bn, L] f32 (last valid lane = boarder_weight)
    sigma = sigma_ref[...]                     # [bn, L] f32
    bn, L = depth.shape

    # Strictly-upper-triangular ones matrix, built in-kernel (cheap VPU work,
    # avoids an HBM input and its double buffer):  tri[j, i] = 1.0 iff j < i.
    row = jax.lax.broadcasted_iota(jnp.int32, (L, L), 0)
    col = jax.lax.broadcasted_iota(jnp.int32, (L, L), 1)
    tri = (row < col).astype(jnp.float32)

    # s_i = relu(sigma_i) * delta_i ;  alpha_i = 1 - exp(-s_i)
    s = jnp.maximum(sigma, 0.0) * delta
    alpha = 1.0 - jnp.exp(-s)

    # Exclusive cumulative sum of s along the lane axis as one MXU matmul:
    #   ecs[:, i] = sum_{j < i} s[:, j]   ->   T_i = exp(-ecs_i)
    ecs = jnp.dot(s, tri, preferred_element_type=jnp.float32,
                  precision=jax.lax.Precision.HIGHEST)
    weights = alpha * jnp.exp(-ecs)            # [bn, L]

    w_ref[...] = weights

    # Packed lane-dense small outputs: [8, bn] slab.
    for c in range(3):                         # color channels (static unroll)
        rgb_c = rgb_ref[c]                     # [bn, L]
        color_c = jnp.sum(jax.nn.sigmoid(rgb_c) * weights, axis=-1)      # [bn]
        small_ref[c:c + 1, :] = color_c[None, :]
    small_ref[3:4, :] = jnp.sum(weights * depth, axis=-1)[None, :]       # depth out
    small_ref[4:5, :] = jnp.sum(weights, axis=-1)[None, :]               # acc_map
    small_ref[5:8, :] = jnp.zeros((3, bn), jnp.float32)                  # padding rows


def volume_render(depth, rgb, sigma, noise=0.0, *, boarder_weight=1e10,
                  block_n=512, key=None):
    """depth: [N, L, 1], rgb: [N, L, 3], sigma: [N, L, 1] (float32).

    Returns (color [N,3], depth [N,1], acc_map [N,1], weights [N,L,1]),
    matching PyTorch VolumeRenderer.forward.
    """
    N, L, _ = depth.shape

    if noise > 0.0:
        # TODO(synk): gaussian noise on sigma uses jax.random in the wrapper
        # (RNG itself is not part of the kernel), matching `sigma += randn*noise`.
        assert key is not None, "pass key= when noise > 0"
        sigma = sigma + jax.random.normal(key, sigma.shape, sigma.dtype) * noise

    depth2 = depth[..., 0].astype(jnp.float32)                  # [N, L]
    sigma2 = sigma[..., 0].astype(jnp.float32)                  # [N, L]
    # delta_i = depth_{i+1} - depth_i; last entry = boarder_weight.  Done in the
    # same XLA prep pass that pads/transposes the inputs (exact, no in-kernel roll).
    delta = jnp.concatenate(
        [depth2[:, 1:] - depth2[:, :-1],
         jnp.full((N, 1), boarder_weight, jnp.float32)], axis=-1)        # [N, L]
    rgb_t = jnp.transpose(rgb, (2, 0, 1)).astype(jnp.float32)            # [3, N, L]

    # Pad samples (lane axis) to a multiple of 128; pad rays to the ray block.
    # Padded samples have sigma = 0 -> alpha = 0 -> weights exactly 0.
    L_pad = _round_up(L, 128)
    if N <= block_n:
        block_n = _round_up(N, 8)
    else:
        block_n = max(128, _round_up(block_n, 128))
    N_pad = _round_up(N, block_n)

    pad2 = lambda x: jnp.pad(x, ((0, N_pad - N), (0, L_pad - L)))
    depth_p = pad2(depth2)
    sigma_p = pad2(sigma2)
    delta_p = pad2(delta)
    rgb_p = jnp.pad(rgb_t, ((0, 0), (0, N_pad - N), (0, L_pad - L)))

    grid = (N_pad // block_n,)

    small, weights = pl.pallas_call(
        _render_kernel,
        out_shape=(
            jax.ShapeDtypeStruct((8, N_pad), jnp.float32),       # packed color/depth/acc
            jax.ShapeDtypeStruct((N_pad, L_pad), jnp.float32),   # weights
        ),
        grid=grid,
        in_specs=[
            pl.BlockSpec((block_n, L_pad), lambda i: (i, 0)),        # depth
            pl.BlockSpec((block_n, L_pad), lambda i: (i, 0)),        # delta
            pl.BlockSpec((block_n, L_pad), lambda i: (i, 0)),        # sigma
            pl.BlockSpec((3, block_n, L_pad), lambda i: (0, i, 0)),  # rgb
        ],
        out_specs=(
            pl.BlockSpec((8, block_n), lambda i: (0, i)),            # lane-dense slab
            pl.BlockSpec((block_n, L_pad), lambda i: (i, 0)),        # weights
        ),
        compiler_params=pltpu.CompilerParams(
            dimension_semantics=("parallel",)),
    )(depth_p, delta_p, sigma_p, rgb_p)

    color = small[0:3, :N].T                  # [N, 3]
    dout = small[3:4, :N].T                   # [N, 1]
    acc = small[4:5, :N].T                    # [N, 1]
    return color, dout, acc, weights[:N, :L, None]


def volume_render_ref(depth, rgb, sigma, boarder_weight=1e10):
    """Pure-JAX reference matching the PyTorch code (true cumprod + 1e-10 eps)."""
    delta = depth[:, 1:, 0] - depth[:, :-1, 0]
    pad = boarder_weight * jnp.ones_like(delta[:, :1])
    delta = jnp.concatenate([delta, pad], axis=-1)
    alpha = 1.0 - jnp.exp(-jax.nn.relu(sigma[..., 0]) * delta)
    w = 1.0 - alpha + 1e-10
    trans = jnp.cumprod(
        jnp.concatenate([jnp.ones((alpha.shape[0], 1), alpha.dtype), w], -1),
        axis=-1)[:, :-1]
    weights = (alpha * trans)[..., None]
    color = jnp.sum(jax.nn.sigmoid(rgb) * weights, axis=1)
    dep = jnp.sum(weights * depth, axis=1)
    acc = jnp.sum(weights, axis=1)
    return color, dep, acc, weights


if __name__ == "__main__":
    key = jax.random.PRNGKey(0)
    k1, k2, k3 = jax.random.split(key, 3)

    N, L = 16, 8  # num rays, num samples per ray (small demo shapes)
    depth = jnp.cumsum(
        jax.random.uniform(k1, (N, L, 1), jnp.float32, 0.05, 0.5), axis=1)
    rgb = jax.random.normal(k2, (N, L, 3), jnp.float32)
    sigma = jax.random.normal(k3, (N, L, 1), jnp.float32)

    color, dep, acc, weights = jax.block_until_ready(
        volume_render(depth, rgb, sigma))

    color_r, dep_r, acc_r, weights_r = volume_render_ref(depth, rgb, sigma)

    np.testing.assert_allclose(np.asarray(color), np.asarray(color_r),
                               rtol=5e-3, atol=5e-4)
    np.testing.assert_allclose(np.asarray(dep), np.asarray(dep_r),
                               rtol=5e-3, atol=5e-4)
    np.testing.assert_allclose(np.asarray(acc), np.asarray(acc_r),
                               rtol=5e-3, atol=5e-4)
    np.testing.assert_allclose(np.asarray(weights), np.asarray(weights_r),
                               rtol=5e-3, atol=5e-4)

    assert color.shape == (N, 3) and dep.shape == (N, 1)
    assert acc.shape == (N, 1) and weights.shape == (N, L, 1)
    print("KERNEL_OK")
</pallas_src>

<mosaic_0001>
module attributes {stable_mosaic.version = 11 : i64} {
  func.func @_render_kernel(%arg0: i32, %arg1: memref<16x128xf32, #tpu.memory_space<vmem>>, %arg2: memref<16x128xf32, #tpu.memory_space<vmem>>, %arg3: memref<16x128xf32, #tpu.memory_space<vmem>>, %arg4: memref<3x16x128xf32, #tpu.memory_space<vmem>>, %arg5: memref<8x16xf32, #tpu.memory_space<vmem>>, %arg6: memref<16x128xf32, #tpu.memory_space<vmem>>) attributes {dimension_semantics = [#tpu.dimension_semantics<parallel>], iteration_bounds = array<i64: 1>, scalar_prefetch = 0 : i64, scratch_operands = 0 : i64, tpu.core_type = #tpu.core_type<tc>, window_params = [{transform_indices = @transform_0, window_bounds = array<i64: 16, 128>}, {transform_indices = @transform_1, window_bounds = array<i64: 16, 128>}, {transform_indices = @transform_2, window_bounds = array<i64: 16, 128>}, {transform_indices = @transform_3, window_bounds = array<i64: 3, 16, 128>}, {transform_indices = @transform_4, window_bounds = array<i64: 8, 16>}, {transform_indices = @transform_5, window_bounds = array<i64: 16, 128>}]} {
    %c0 = arith.constant 0 : index
    %c0_0 = arith.constant 0 : index
    %0 = vector.load %arg1[%c0, %c0_0] : memref<16x128xf32, #tpu.memory_space<vmem>>, vector<16x128xf32>
    %c0_1 = arith.constant 0 : index
    %c0_2 = arith.constant 0 : index
    %1 = vector.load %arg2[%c0_1, %c0_2] : memref<16x128xf32, #tpu.memory_space<vmem>>, vector<16x128xf32>
    %c0_3 = arith.constant 0 : index
    %c0_4 = arith.constant 0 : index
    %2 = vector.load %arg3[%c0_3, %c0_4] : memref<16x128xf32, #tpu.memory_space<vmem>>, vector<16x128xf32>
    %3 = tpu.iota {dimensions = array<i32: 0>} : vector<128x128xi32>
    %4 = tpu.iota {dimensions = array<i32: 1>} : vector<128x128xi32>
    %5 = arith.cmpi slt, %3, %4 : vector<128x128xi32>
    %6 = arith.extui %5 : vector<128x128xi1> to vector<128x128xi32>
    %7 = arith.sitofp %6 : vector<128x128xi32> to vector<128x128xf32>
    %cst = arith.constant 0.000000e+00 : f32
    %8 = vector.broadcast %cst : f32 to vector<16x128xf32>
    %9 = arith.maximumf %2, %8 : vector<16x128xf32>
    %10 = arith.mulf %9, %1 : vector<16x128xf32>
    %cst_5 = arith.constant 0.000000e+00 : f32
    %11 = vector.broadcast %cst_5 : f32 to vector<16x128xf32>
    %12 = arith.subf %11, %10 : vector<16x128xf32>
    %13 = math.exp %12 : vector<16x128xf32>
    %cst_6 = arith.constant 1.000000e+00 : f32
    %14 = vector.broadcast %cst_6 : f32 to vector<16x128xf32>
    %15 = arith.subf %14, %13 : vector<16x128xf32>
    %cst_7 = arith.constant dense<0.000000e+00> : vector<16x128xf32>
    %16 = tpu.matmul %10, %7, %cst_7 {dimension_numbers = #tpu.dot_dimension_numbers<[1], [0], [0], [1], [0, 0, 1, 1], [], []>, precision = #tpu.contract_precision<fp32>} : vector<16x128xf32>, vector<128x128xf32>, vector<16x128xf32> -> vector<16x128xf32>
    %cst_8 = arith.constant 0.000000e+00 : f32
    %17 = vector.broadcast %cst_8 : f32 to vector<16x128xf32>
    %18 = arith.subf %17, %16 : vector<16x128xf32>
    %19 = math.exp %18 : vector<16x128xf32>
    %20 = arith.mulf %15, %19 : vector<16x128xf32>
    %c0_9 = arith.constant 0 : index
    %c0_10 = arith.constant 0 : index
    %21 = vector.load %arg6[%c0_9, %c0_10] : memref<16x128xf32, #tpu.memory_space<vmem>>, vector<16x128xf32>
    tpu.vector_store %arg6[%c0_9, %c0_10], %20 {strides = array<i32>} : memref<16x128xf32, #tpu.memory_space<vmem>>, vector<16x128xf32>,
    %c0_11 = arith.constant 0 : index
    %c0_12 = arith.constant 0 : index
    %c0_13 = arith.constant 0 : index
    %22 = vector.load %arg4[%c0_11, %c0_12, %c0_13] : memref<3x16x128xf32, #tpu.memory_space<vmem>>, vector<1x16x128xf32>
    %23 = vector.shape_cast %22 : vector<1x16x128xf32> to vector<16x128xf32>
    %24 = arith.negf %23 : vector<16x128xf32>
    %25 = math.exp %24 : vector<16x128xf32>
    %cst_14 = arith.constant 1.000000e+00 : f32
    %26 = vector.broadcast %cst_14 : f32 to vector<16x128xf32>
    %27 = arith.addf %26, %25 : vector<16x128xf32>
    %28 = arith.divf %26, %27 : vector<16x128xf32>
    %29 = arith.mulf %28, %20 : vector<16x128xf32>
    %cst_15 = arith.constant dense<0.000000e+00> : vector<16xf32>
    %30 = vector.multi_reduction <add>, %29, %cst_15 [1] : vector<16x128xf32> to vector<16xf32>
    %31 = vector.shape_cast %30 : vector<16xf32> to vector<1x16xf32>
    %c0_16 = arith.constant 0 : index
    %c0_17 = arith.constant 0 : index
    %32 = vector.load %arg5[%c0_16, %c0_17] : memref<8x16xf32, #tpu.memory_space<vmem>>, vector<1x16xf32>
    tpu.vector_store %arg5[%c0_16, %c0_17], %31 {strides = array<i32>} : memref<8x16xf32, #tpu.memory_space<vmem>>, vector<1x16xf32>,
    %c1 = arith.constant 1 : index
    %c0_18 = arith.constant 0 : index
    %c0_19 = arith.constant 0 : index
    %33 = vector.load %arg4[%c1, %c0_18, %c0_19] : memref<3x16x128xf32, #tpu.memory_space<vmem>>, vector<1x16x128xf32>
    %34 = vector.shape_cast %33 : vector<1x16x128xf32> to vector<16x128xf32>
    %35 = arith.negf %34 : vector<16x128xf32>
    %36 = math.exp %35 : vector<16x128xf32>
    %cst_20 = arith.constant 1.000000e+00 : f32
    %37 = vector.broadcast %cst_20 : f32 to vector<16x128xf32>
    %38 = arith.addf %37, %36 : vector<16x128xf32>
    %39 = arith.divf %37, %38 : vector<16x128xf32>
    %40 = arith.mulf %39, %20 : vector<16x128xf32>
    %cst_21 = arith.constant dense<0.000000e+00> : vector<16xf32>
    %41 = vector.multi_reduction <add>, %40, %cst_21 [1] : vector<16x128xf32> to vector<16xf32>
    %42 = vector.shape_cast %41 : vector<16xf32> to vector<1x16xf32>
    %c1_22 = arith.constant 1 : index
    %c0_23 = arith.constant 0 : index
    %43 = vector.load %arg5[%c1_22, %c0_23] : memref<8x16xf32, #tpu.memory_space<vmem>>, vector<1x16xf32>
    tpu.vector_store %arg5[%c1_22, %c0_23], %42 {strides = array<i32>} : memref<8x16xf32, #tpu.memory_space<vmem>>, vector<1x16xf32>,
    %c2 = arith.constant 2 : index
    %c0_24 = arith.constant 0 : index
    %c0_25 = arith.constant 0 : index
    %44 = vector.load %arg4[%c2, %c0_24, %c0_25] : memref<3x16x128xf32, #tpu.memory_space<vmem>>, vector<1x16x128xf32>
    %45 = vector.shape_cast %44 : vector<1x16x128xf32> to vector<16x128xf32>
    %46 = arith.negf %45 : vector<16x128xf32>
    %47 = math.exp %46 : vector<16x128xf32>
    %cst_26 = arith.constant 1.000000e+00 : f32
    %48 = vector.broadcast %cst_26 : f32 to vector<16x128xf32>
    %49 = arith.addf %48, %47 : vector<16x128xf32>
    %50 = arith.divf %48, %49 : vector<16x128xf32>
    %51 = arith.mulf %50, %20 : vector<16x128xf32>
    %cst_27 = arith.constant dense<0.000000e+00> : vector<16xf32>
    %52 = vector.multi_reduction <add>, %51, %cst_27 [1] : vector<16x128xf32> to vector<16xf32>
    %53 = vector.shape_cast %52 : vector<16xf32> to vector<1x16xf32>
    %c2_28 = arith.constant 2 : index
    %c0_29 = arith.constant 0 : index
    %54 = vector.load %arg5[%c2_28, %c0_29] : memref<8x16xf32, #tpu.memory_space<vmem>>, vector<1x16xf32>
    tpu.vector_store %arg5[%c2_28, %c0_29], %53 {strides = array<i32>} : memref<8x16xf32, #tpu.memory_space<vmem>>, vector<1x16xf32>,
    %55 = arith.mulf %20, %0 : vector<16x128xf32>
    %cst_30 = arith.constant dense<0.000000e+00> : vector<16xf32>
    %56 = vector.multi_reduction <add>, %55, %cst_30 [1] : vector<16x128xf32> to vector<16xf32>
    %57 = vector.shape_cast %56 : vector<16xf32> to vector<1x16xf32>
    %c3 = arith.constant 3 : index
    %c0_31 = arith.constant 0 : index
    %58 = vector.load %arg5[%c3, %c0_31] : memref<8x16xf32, #tpu.memory_space<vmem>>, vector<1x16xf32>
    tpu.vector_store %arg5[%c3, %c0_31], %57 {strides = array<i32>} : memref<8x16xf32, #tpu.memory_space<vmem>>, vector<1x16xf32>,
    %cst_32 = arith.constant dense<0.000000e+00> : vector<16xf32>
    %59 = vector.multi_reduction <add>, %20, %cst_32 [1] : vector<16x128xf32> to vector<16xf32>
    %60 = vector.shape_cast %59 : vector<16xf32> to vector<1x16xf32>
    %c4 = arith.constant 4 : index
    %c0_33 = arith.constant 0 : index
    %61 = vector.load %arg5[%c4, %c0_33] : memref<8x16xf32, #tpu.memory_space<vmem>>, vector<1x16xf32>
    tpu.vector_store %arg5[%c4, %c0_33], %60 {strides = array<i32>} : memref<8x16xf32, #tpu.memory_space<vmem>>, vector<1x16xf32>,
    %cst_34 = arith.constant 0.000000e+00 : f32
    %62 = vector.broadcast %cst_34 : f32 to vector<3x16xf32>
    %c5 = arith.constant 5 : index
    %c0_35 = arith.constant 0 : index
    %63 = vector.load %arg5[%c5, %c0_35] : memref<8x16xf32, #tpu.memory_space<vmem>>, vector<3x16xf32>
    tpu.vector_store %arg5[%c5, %c0_35], %62 {strides = array<i32>} : memref<8x16xf32, #tpu.memory_space<vmem>>, vector<3x16xf32>,
    return
  }
  func.func @transform_0(%arg0: i32) -> (i32, i32) {
    %c0_i32 = arith.constant 0 : i32
    %c0_i32_0 = arith.constant 0 : i32
    return %arg0, %c0_i32 : i32, i32
  }
  func.func @transform_1(%arg0: i32) -> (i32, i32) {
    %c0_i32 = arith.constant 0 : i32
    %c0_i32_0 = arith.constant 0 : i32
    return %arg0, %c0_i32 : i32, i32
  }
  func.func @transform_2(%arg0: i32) -> (i32, i32) {
    %c0_i32 = arith.constant 0 : i32
    %c0_i32_0 = arith.constant 0 : i32
    return %arg0, %c0_i32 : i32, i32
  }
  func.func @transform_3(%arg0: i32) -> (i32, i32, i32) {
    %c0_i32 = arith.constant 0 : i32
    %c0_i32_0 = arith.constant 0 : i32
    %c0_i32_1 = arith.constant 0 : i32
    return %c0_i32, %arg0, %c0_i32_0 : i32, i32, i32
  }
  func.func @transform_4(%arg0: i32) -> (i32, i32) {
    %c0_i32 = arith.constant 0 : i32
    %c0_i32_0 = arith.constant 0 : i32
    return %c0_i32, %arg0 : i32, i32
  }
  func.func @transform_5(%arg0: i32) -> (i32, i32) {
    %c0_i32 = arith.constant 0 : i32
    %c0_i32_0 = arith.constant 0 : i32
    return %arg0, %c0_i32 : i32, i32
  }
}

</mosaic_0001>

<bundles_post_ra>
// kernel: tpu_custom_call.1
= control target key start
LH: loop header
LB: loop body
LE: loop exit
PB: predicated region body
PF: predicated region fallthrough
CT: control target
= control target key end

     0   :  { %11 = vsyncpa [#allocation3], 0  ;;  %s1737_s0 = inlined_call_operand.hbm [shape: f32[16,128], index: 0, kind: input, shape index: {}]   ;;  %s1738_s1 = inlined_call_operand.hbm [shape: f32[16,128], index: 1, kind: input, shape index: {}]   ;;  %s1739_s2 = inlined_call_operand.hbm [shape: f32[16,128], index: 2, kind: input, shape index: {}]   ;;  %s1740_s3 = inlined_call_operand.hbm [shape: f32[3,16,128], index: 3, kind: input, shape index: {}]   ;;  %s1741_s4 = inlined_call_operand.hbm [shape: f32[8,16], index: 4, kind: output, shape index: {0}]   ;;  %s1742_s5 = inlined_call_operand.hbm [shape: f32[16,128], index: 5, kind: output, shape index: {1}]  }
   0x1   :  { %12 = vsyncpa [#allocation6], 0 }
   0x2   :  { %13 = vsyncpa [#allocation9], 0 }
   0x3   :  { %14 = vsyncpa [#allocation4], 0 }
   0x4   :  { %15 = vsyncpa [#allocation12], 0  ;;  %s33_s20 = sshll.u32 %s1738_s1, 4  ;;  %s1076_s21 = smov [#allocation5]   ;;  %s34_s20 = int_to_ptr.hbm [resolvable:$true] %s33_s20 }
   0x5   :  { %s35_s22 = sshll.u32 %s1076_s21, 4  ;;  %s20_s25 = sshll.u32 %s1737_s0, 4  ;;  %s36_s22 = int_to_ptr.vmem [resolvable:$true] %s35_s22  ;;  %s21_s25 = int_to_ptr.hbm [resolvable:$true] %s20_s25 }
   0x6   :  { %s1077_s26 = smov 128   ;;  %s1078_s27 = smov 8  }
   0x7   :  { %41 = dma.hbm_to_vmem [thread:$0]  %s34_s20, 256, %s36_s22, [#allocation6], %s1077_s26, %s1077_s26, %s1078_s27  }
   0x8   :  { %s1079_s28 = smov [#allocation2]   ;;  %s46_s1 = sshll.u32 %s1739_s2, 4  ;;  %s47_s1 = int_to_ptr.hbm [resolvable:$true] %s46_s1 }
   0x9   :  { %s22_s29 = sshll.u32 %s1079_s28, 4  ;;  %s59_s8 = sshll.u32 %s1740_s3, 4  ;;  %s23_s29 = int_to_ptr.vmem [resolvable:$true] %s22_s29  ;;  %s60_s8 = int_to_ptr.hbm [resolvable:$true] %s59_s8 }
   0xa   :  { %28 = dma.hbm_to_vmem [thread:$0]  %s21_s25, 256, %s23_s29, [#allocation3], %s1077_s26, %s1077_s26, %s1078_s27  }
   0xb   :  { %s1080_s9 = smov [#allocation7]   ;;  %s1081_s11 = smov [#allocation8]  }
   0xc   :  { %s48_s10 = sshll.u32 %s1080_s9, 4  ;;  %s61_s2 = sshll.u32 %s1081_s11, 4  ;;  %s49_s10 = int_to_ptr.vmem [resolvable:$true] %s48_s10  ;;  %s62_s2 = int_to_ptr.vmem [resolvable:$true] %s61_s2 }
   0xd   :  { %54 = dma.hbm_to_vmem [thread:$0]  %s47_s1, 256, %s49_s10, [#allocation6], %s1077_s26, %s1077_s26, %s1078_s27  }
   0xe   :  { %67 = dma.hbm_to_vmem [thread:$0]  %s60_s8, 768, %s62_s2, [#allocation9], %s1077_s26, %s1077_s26, %s1078_s27  }
   0xf   :  { %1066 = dma.done.wait [#allocation3], 256  }
  0x10   :  { %1067 = vsyncadd [#allocation3], 4294967040 }
  0x11   :  { %1068 = dma.done.wait [#allocation6], 512  }
  0x12   :  { %1069 = vsyncadd [#allocation6], 4294966784  ;;  %v90_v0 = vlaneseq }
  0x13   :  { %1070 = dma.done.wait [#allocation9], 768  }
  0x14   :  { %1071 = vsyncadd [#allocation9], 4294966528  ;;  %v1140_v1 = vshrl.u32 %v90_v0, 7  ;;  %v1142_v2 = vand.u32 127, %v90_v0  ;;  %v1082_v15 = vmov 1.0   ;;  %v1083_v16 = vmov 0.0  }
  0x15   :  { %v662_v13 = vld [vmem:[#allocation8 + $0x20] sm:$0xff]  ;;  %v608_v20 = vld [vmem:[#allocation8 + $0x10] sm:$0xff]  ;;  %s1084_s3 = smov [#allocation11]   ;;  %s758_s15 = sshll.u32 %s1742_s5, 4  ;;  %s759_s15 = int_to_ptr.hbm [resolvable:$true] %s758_s15 }
  0x16   :  { %v106_v3 = vadd.s32 120, %v1140_v1  ;;  %v105_v4 = vadd.s32 112, %v1140_v1  ;;  %v104_v5 = vadd.s32 104, %v1140_v1  ;;  %v103_v6 = vadd.s32 96, %v1140_v1  ;;  %v551_v26 = vld [vmem:[#allocation8] sm:$0xff]  ;;  %s756_s12 = sshll.u32 %s1084_s3, 4  ;;  %s757_s12 = int_to_ptr.vmem [resolvable:$true] %s756_s12 }
  0x17   :  { %v102_v7 = vadd.s32 88, %v1140_v1  ;;  %v101_v8 = vadd.s32 80, %v1140_v1  ;;  %v100_v9 = vadd.s32 72, %v1140_v1  ;;  %v99_v10 = vadd.s32 64, %v1140_v1  ;;  %s1085_s5 = smov [#allocation10]   ;;  %s748_s19 = sshll.u32 %s1741_s4, 4  ;;  %s749_s19 = int_to_ptr.hbm [resolvable:$true] %s748_s19 }
  0x18   :  { %vm1153_vm0 = vcmp.lt.s32.totalorder %v106_v3, %v1142_v2  ;;  %vm1158_vm1 = vcmp.lt.s32.totalorder %v105_v4, %v1142_v2  ;;  %vm1163_vm2 = vcmp.lt.s32.totalorder %v104_v5, %v1142_v2  ;;  %vm1168_vm3 = vcmp.lt.s32.totalorder %v103_v6, %v1142_v2  ;;  %s746_s16 = sshll.u32 %s1085_s5, 4  ;;  %s747_s16 = int_to_ptr.vmem [resolvable:$true] %s746_s16 }
  0x19   :  { %794 = vmatpush.msk.msra.mxu0 %vm1153_vm0, %v1082_v15  ;;  %v793_v17 = vsel %vm1153_vm0, 1.0, %v1083_v16  ;;  %v792_v18 = vsel %vm1158_vm1, 1.0, %v1083_v16  ;;  %810 = vmatpush.msk.msra.mxu3 %vm1153_vm0, %v1082_v15  ;;  %v791_v19 = vsel %vm1163_vm2, 1.0, %v1083_v16  ;;  %vm1188_vm4 = vcmp.lt.s32.totalorder %v102_v7, %v1142_v2 }
  0x1a   :  { %v219_v21 = vsub.f32 %v793_v17, %v793_v17  ;;  %v225_v22 = vsub.f32 %v792_v18, %v792_v18  ;;  %v231_v23 = vsub.f32 %v791_v19, %v791_v19  ;;  %v790_v24 = vsel %vm1168_vm3, 1.0, %v1083_v16 }
  0x1b   :  { %795 = vmatpush.msk.msra.mxu0 %vm1158_vm1, %v1082_v15  ;;  %811 = vmatpush.msk.msra.mxu3 %vm1158_vm1, %v1082_v15  ;;  %v237_v25 = vsub.f32 %v790_v24, %v790_v24  ;;  %vm1202_vm5 = vcmp.lt.s32.totalorder %v101_v8, %v1142_v2  ;;  %v789_v27 = vsel %vm1188_vm4, 1.0, %v1083_v16  ;;  %vm1210_vm6 = vcmp.lt.s32.totalorder %v100_v9, %v1142_v2 }
  0x1c   :  { %325 = vmatpush.msra.mxu2 %v219_v21  ;;  %v1214_v29 = vand.u32 4294901760, %v219_v21  ;;  %v1216_v30 = vand.u32 4294901760, %v225_v22  ;;  %v243_v31 = vsub.f32 %v789_v27, %v789_v27  ;;  %v1218_v32 = vand.u32 4294901760, %v231_v23 }
  0x1d   :  { %796 = vmatpush.msk.msra.mxu0 %vm1163_vm2, %v1082_v15  ;;  %812 = vmatpush.msk.msra.mxu3 %vm1163_vm2, %v1082_v15  ;;  %v788_v33 = vsel %vm1202_vm5, 1.0, %v1083_v16  ;;  %vm1230_vm7 = vcmp.lt.s32.totalorder %v99_v10, %v1142_v2  ;;  %v1234_v35 = vand.u32 4294901760, %v237_v25  ;;  %v787_v36 = vsel %vm1210_vm6, 1.0, %v1083_v16 }
  0x1e   :  { %328 = vmatpush.msra.mxu2 %v225_v22  ;;  %v221_v37 = vsub.f32 %v219_v21, %v1214_v29  ;;  %v227_v38 = vsub.f32 %v225_v22, %v1216_v30  ;;  %v233_v39 = vsub.f32 %v231_v23, %v1218_v32  ;;  %v249_v40 = vsub.f32 %v788_v33, %v788_v33 }
  0x1f   :  { %797 = vmatpush.msk.msra.mxu0 %vm1168_vm3, %v1082_v15  ;;  %813 = vmatpush.msk.msra.mxu3 %vm1168_vm3, %v1082_v15  ;;  %v239_v41 = vsub.f32 %v237_v25, %v1234_v35  ;;  %v255_v42 = vsub.f32 %v787_v36, %v787_v36  ;;  %v98_v43 = vadd.s32 56, %v1140_v1  ;;  %v1250_v44 = vand.u32 4294901760, %v243_v31 }
  0x20   :  { %331 = vmatpush.msra.mxu2 %v231_v23  ;;  %v222_v45 = vand.u32 4294901760, %v221_v37  ;;  %v228_v46 = vand.u32 4294901760, %v227_v38  ;;  %v786_v47 = vsel %vm1230_vm7, 1.0, %v1083_v16  ;;  %v234_v48 = vand.u32 4294901760, %v233_v39 }
  0x21   :  { %798 = vmatpush.msk.msra.mxu0 %vm1188_vm4, %v1082_v15  ;;  %814 = vmatpush.msk.msra.mxu3 %vm1188_vm4, %v1082_v15  ;;  %vm1262_vm8 = vcmp.lt.s32.totalorder %v98_v43, %v1142_v2  ;;  %v245_v50 = vsub.f32 %v243_v31, %v1250_v44  ;;  %v261_v51 = vsub.f32 %v786_v47, %v786_v47  ;;  %v97_v52 = vadd.s32 48, %v1140_v1 }
  0x22   :  { %223 = vmatpush.msra.mxu1 %v222_v45  ;;  %334 = vmatpush.msra.mxu2 %v237_v25  ;;  %v1268_v53 = vand.u32 4294901760, %v249_v40  ;;  %v785_v54 = vsel %vm1262_vm8, 1.0, %v1083_v16  ;;  %v96_v55 = vadd.s32 40, %v1140_v1  ;;  %v240_v56 = vand.u32 4294901760, %v239_v41 }
  0x23   :  { %799 = vmatpush.msk.msra.mxu0 %vm1202_vm5, %v1082_v15  ;;  %815 = vmatpush.msk.msra.mxu3 %vm1202_vm5, %v1082_v15  ;;  %v267_v57 = vsub.f32 %v785_v54, %v785_v54  ;;  %v1280_v58 = vand.u32 4294901760, %v255_v42  ;;  %v95_v59 = vadd.s32 32, %v1140_v1  ;;  %vm1284_vm9 = vcmp.lt.s32.totalorder %v97_v52, %v1142_v2 }
  0x24   :  { %229 = vmatpush.msra.mxu1 %v228_v46  ;;  %337 = vmatpush.msra.mxu2 %v243_v31  ;;  %v251_v61 = vsub.f32 %v249_v40, %v1268_v53  ;;  %vm1290_vm10 = vcmp.lt.s32.totalorder %v96_v55, %v1142_v2  ;;  %v1294_v63 = vand.u32 4294901760, %v261_v51  ;;  %v784_v0 = vsel %vm1284_vm9, 1.0, %v1083_v16 }
  0x25   :  { %800 = vmatpush.msk.msra.mxu0 %vm1210_vm6, %v1082_v15  ;;  %816 = vmatpush.msk.msra.mxu3 %vm1210_vm6, %v1082_v15  ;;  %vm1306_vm11 = vcmp.lt.s32.totalorder %v95_v59, %v1142_v2  ;;  %v783_v4 = vsel %vm1290_vm10, 1.0, %v1083_v16  ;;  %v246_v5 = vand.u32 4294901760, %v245_v50  ;;  %v257_v6 = vsub.f32 %v255_v42, %v1280_v58 }
  0x26   :  { %235 = vmatpush.msra.mxu1 %v234_v48  ;;  %340 = vmatpush.msra.mxu2 %v249_v40  ;;  %v273_v7 = vsub.f32 %v784_v0, %v784_v0  ;;  %v279_v8 = vsub.f32 %v783_v4, %v783_v4  ;;  %v252_v9 = vand.u32 4294901760, %v251_v61  ;;  %v94_v10 = vadd.s32 24, %v1140_v1 }
  0x27   :  { %801 = vmatpush.msk.msra.mxu0 %vm1230_vm7, %v1082_v15  ;;  %817 = vmatpush.msk.msra.mxu3 %vm1230_vm7, %v1082_v15  ;;  %v1321_v17 = vand.u32 4294901760, %v267_v57  ;;  %v782_v18 = vsel %vm1306_vm11, 1.0, %v1083_v16  ;;  %v263_v19 = vsub.f32 %v261_v51, %v1294_v63  ;;  %v93_v22 = vadd.s32 16, %v1140_v1 }
  0x28   :  { %241 = vmatpush.msra.mxu1 %v240_v56  ;;  %343 = vmatpush.msra.mxu2 %v255_v42  ;;  %v285_v21 = vsub.f32 %v782_v18, %v782_v18  ;;  %v1328_v23 = vand.u32 4294901760, %v273_v7  ;;  %vm1337_vm12 = vcmp.lt.s32.totalorder %v94_v10, %v1142_v2  ;;  %v92_v27 = vadd.s32 8, %v1140_v1  ;;  %v88_v42 = vld [vmem:[#allocation7] sm:$0xff] }
  0x29   :  { %802 = vmatpush.msk.msra.mxu0 %vm1262_vm8, %v1082_v15  ;;  %818 = vmatpush.msk.msra.mxu3 %vm1262_vm8, %v1082_v15  ;;  %v269_v25 = vsub.f32 %v267_v57, %v1321_v17  ;;  %v1343_v31 = vand.u32 4294901760, %v279_v8  ;;  %v258_v33 = vand.u32 4294901760, %v257_v6  ;;  %vm1346_vm13 = vcmp.lt.s32.totalorder %v93_v22, %v1142_v2 }
  0x2a   :  { %247 = vmatpush.msra.mxu1 %v246_v5  ;;  %346 = vmatpush.msra.mxu2 %v261_v51  ;;  %v275_v37 = vsub.f32 %v273_v7, %v1328_v23  ;;  %v781_v38 = vsel %vm1337_vm12, 1.0, %v1083_v16  ;;  %vm1361_vm14 = vcmp.lt.s32.totalorder %v92_v27, %v1142_v2  ;;  %vm1367_vm15 = vcmp.lt.s32.totalorder %v1140_v1, %v1142_v2  ;;  %v86_v51 = vld [vmem:[#allocation5] sm:$0xff] }
  0x2b   :  { %803 = vmatpush.msk.msra.mxu0 %vm1284_vm9, %v1082_v15  ;;  %819 = vmatpush.msk.msra.mxu3 %vm1284_vm9, %v1082_v15  ;;  %v291_v39 = vsub.f32 %v781_v38, %v781_v38  ;;  %v264_v43 = vand.u32 4294901760, %v263_v19  ;;  %v780_v45 = vsel %vm1346_vm13, 1.0, %v1083_v16  ;;  %v1374_v46 = vand.u32 4294901760, %v285_v21 }
  0x2c   :  { %253 = vmatpush.msra.mxu1 %v252_v9  ;;  %349 = vmatpush.msra.mxu2 %v267_v57  ;;  %v779_v47 = vsel %vm1361_vm14, 1.0, %v1083_v16  ;;  %v270_v1 = vand.u32 4294901760, %v269_v25  ;;  %v281_v48 = vsub.f32 %v279_v8, %v1343_v31  ;;  %v297_v50 = vsub.f32 %v780_v45, %v780_v45  ;;  %v89_v9 = vld [vmem:[#allocation7 + $0x8] sm:$0xff] }
  0x2d   :  { %804 = vmatpush.msk.msra.mxu0 %vm1290_vm10, %v1082_v15  ;;  %820 = vmatpush.msk.msra.mxu3 %vm1290_vm10, %v1082_v15  ;;  %v303_v52 = vsub.f32 %v779_v47, %v779_v47  ;;  %v1386_v54 = vand.u32 4294901760, %v291_v39  ;;  %v778_v55 = vsel %vm1367_vm15, 1.0, %v1083_v16  ;;  %v157_v56 = vmax.f32 %v88_v42, 0.0 }
  0x2e   :  { %259 = vmatpush.msra.mxu1 %v258_v33  ;;  %352 = vmatpush.msra.mxu2 %v273_v7  ;;  %v276_v57 = vand.u32 4294901760, %v275_v37  ;;  %v287_v59 = vsub.f32 %v285_v21, %v1374_v46  ;;  %v309_v61 = vsub.f32 %v778_v55, %v778_v55  ;;  %v1398_v0 = vand.u32 4294901760, %v297_v50  ;;  %v87_v33 = vld [vmem:[#allocation5 + $0x8] sm:$0xff] }
  0x2f   :  { %805 = vmatpush.msk.msra.mxu0 %vm1306_vm11, %v1082_v15  ;;  %821 = vmatpush.msk.msra.mxu3 %vm1306_vm11, %v1082_v15  ;;  %v1400_v4 = vmul.f32 %v157_v56, %v86_v51  ;;  %v282_v5 = vand.u32 4294901760, %v281_v48  ;;  %v293_v6 = vsub.f32 %v291_v39, %v1386_v54  ;;  %v1409_v7 = vand.u32 4294901760, %v303_v52 }
  0x30   :  { %265 = vmatpush.msra.mxu1 %v264_v43  ;;  %355 = vmatpush.msra.mxu2 %v279_v8  ;;  %v288_v10 = vand.u32 4294901760, %v287_v59  ;;  %v299_v18 = vsub.f32 %v297_v50, %v1398_v0  ;;  %v1421_v19 = vand.u32 4294901760, %v309_v61  ;;  %v158_v22 = vmax.f32 %v89_v9, 0.0 }
  0x31   :  { %806 = vmatpush.msk.msra.mxu0 %vm1337_vm12, %v1082_v15  ;;  %822 = vmatpush.msk.msra.mxu3 %vm1337_vm12, %v1082_v15  ;;  %v1412_v8 = vand.u32 4294901760, %v1400_v4  ;;  %v294_v25 = vand.u32 4294901760, %v293_v6  ;;  %v305_v27 = vsub.f32 %v303_v52, %v1409_v7  ;;  %v846_v14 = vmul.f32 -1.442695, %v662_v13 }
  0x32   :  { %271 = vmatpush.msra.mxu1 %v270_v1  ;;  %358 = vmatpush.msra.mxu2 %v285_v21  ;;  %v300_v37 = vand.u32 4294901760, %v299_v18  ;;  %v311_v38 = vsub.f32 %v309_v61, %v1421_v19  ;;  %v1446_v42 = vmul.f32 %v158_v22, %v87_v33  ;;  %v844_v28 = vmul.f32 -1.442695, %v608_v20 }
  0x33   :  { %807 = vmatpush.msk.msra.mxu0 %vm1346_vm13, %v1082_v15  ;;  %823 = vmatpush.msk.msra.mxu3 %vm1346_vm13, %v1082_v15  ;;  %v1425_v21 = vsub.f32 %v1400_v4, %v1412_v8  ;;  %v306_v43 = vand.u32 4294901760, %v305_v27  ;;  %890 = vpow2.f32 %v846_v14  ;;  %v842_v34 = vmul.f32 -1.442695, %v551_v26 }
  0x34   :  { %277 = vmatpush.msra.mxu1 %v276_v57  ;;  %361 = vmatpush.msra.mxu2 %v291_v39  ;;  %v312_v45 = vand.u32 4294901760, %v311_v38  ;;  %v1457_v1 = vand.u32 4294901760, %v1446_v42  ;;  %892 = vpow2.f32 %v844_v28 }
  0x35   :  { %808 = vmatpush.msk.msra.mxu0 %vm1361_vm14, %v1082_v15  ;;  %824 = vmatpush.msk.msra.mxu3 %vm1361_vm14, %v1082_v15  ;;  %v203_v39 = vand.u32 4294901760, %v1425_v21  ;;  %894 = vpow2.f32 %v842_v34 }
  0x36   :  { %283 = vmatpush.msra.mxu1 %v282_v5  ;;  %364 = vmatpush.msra.mxu2 %v297_v50 }
  0x37   :  { %809 = vmatpush.msk.msra.mxu0 %vm1367_vm15, %v1082_v15  ;;  %825 = vmatpush.msk.msra.mxu3 %vm1367_vm15, %v1082_v15  ;;  %v204_v47 = vsub.f32 %v1425_v21, %v203_v39 }
  0x38   :  { %289 = vmatpush.msra.mxu1 %v288_v10  ;;  %367 = vmatpush.msra.mxu2 %v303_v52 }
  0x39   :  { %430 = vmatpush.msrb.mxu0 %v1214_v29  ;;  %864 = vmatpush.msk.msrb.mxu3 %vm1153_vm0, %v1082_v15  ;;  %v891_v49 = vpop.eup %890 }
  0x3a   :  { %295 = vmatpush.msra.mxu1 %v294_v25  ;;  %370 = vmatpush.msra.mxu2 %v309_v61  ;;  %v1585_v62 = vadd.f32 1.0, %v891_v49 }
  0x3b   :  { %434 = vmatpush.msrb.mxu0 %v1216_v30  ;;  %865 = vmatpush.msk.msrb.mxu3 %vm1158_vm1, %v1082_v15 }
  0x3c   :  { %848 = vmatpush.msrb.mxu2 %v1214_v29  ;;  %301 = vmatpush.msra.mxu1 %v300_v37  ;;  %v205_v29 = vand.u32 4294901760, %v204_v47 }
  0x3d   :  { %438 = vmatpush.msrb.mxu0 %v1218_v32  ;;  %866 = vmatpush.msk.msrb.mxu3 %vm1163_vm2, %v1082_v15 }
  0x3e   :  { %849 = vmatpush.msrb.mxu2 %v1216_v30  ;;  %307 = vmatpush.msra.mxu1 %v306_v43  ;;  %v210_v30 = vsub.f32 %v1446_v42, %v1457_v1 }
  0x3f   :  { %442 = vmatpush.msrb.mxu0 %v1234_v35  ;;  %867 = vmatpush.msk.msrb.mxu3 %vm1168_vm3, %v1082_v15 }
  0x40   :  { %850 = vmatpush.msrb.mxu2 %v1218_v32  ;;  %313 = vmatpush.msra.mxu1 %v312_v45  ;;  %v211_v32 = vand.u32 4294901760, %v210_v30 }
  0x41   :  { %446 = vmatpush.msrb.mxu0 %v1250_v44  ;;  %868 = vmatpush.msk.msrb.mxu3 %vm1188_vm4, %v1082_v15 }
  0x42   :  { %851 = vmatpush.msrb.mxu2 %v1234_v35  ;;  %826 = vmatpush.msk.msrb.mxu1 %vm1153_vm0, %v1082_v15  ;;  %v212_v11 = vsub.f32 %v210_v30, %v211_v32  ;;  %v663_v35 = vld [vmem:[#allocation8 + $0x28] sm:$0xff]  ;;  %vm677_vm0 = vweird.f32 %v1585_v62 }
  0x43   :  { %450 = vmatpush.msrb.mxu0 %v1268_v53  ;;  %869 = vmatpush.msk.msrb.mxu3 %vm1202_vm5, %v1082_v15 }
  0x44   :  { %852 = vmatpush.msrb.mxu2 %v1250_v44  ;;  %827 = vmatpush.msk.msrb.mxu1 %vm1158_vm1, %v1082_v15  ;;  %v213_v12 = vand.u32 4294901760, %v212_v11  ;;  %v609_v44 = vld [vmem:[#allocation8 + $0x18] sm:$0xff] }
  0x45   :  { %206 = vmatmul.f32.vlgmr.msra.gmra.mxu0 %v205_v29  ;;  %870 = vmatpush.msk.msrb.mxu3 %vm1210_vm6, %v1082_v15 }
  0x46   :  { %454 = vmatpush.msrb.mxu0 %v1280_v58  ;;  %853 = vmatpush.msrb.mxu2 %v1268_v53  ;;  %v847_v53 = vmul.f32 -1.442695, %v663_v35 }
  0x47   :  { %828 = vmatpush.msk.msrb.mxu1 %vm1163_vm2, %v1082_v15  ;;  %373 = vmatmul.f32.vlgmr.msra.gmra.mxu2 %v1425_v21 }
  0x48   :  { %458 = vmatpush.msrb.mxu0 %v1294_v63  ;;  %854 = vmatpush.msrb.mxu2 %v1280_v58  ;;  %v845_v58 = vmul.f32 -1.442695, %v609_v44  ;;  %896 = vpow2.f32 %v847_v53  ;;  %v681_v44 = vand.u32 2147483647, %v1585_v62 }
  0x49   :  { %829 = vmatpush.msk.msrb.mxu1 %vm1168_vm3, %v1082_v15  ;;  %871 = vmatpush.msk.msrb.mxu3 %vm1230_vm7, %v1082_v15 }
  0x4a   :  { %462 = vmatpush.msrb.mxu0 %v1321_v17  ;;  %855 = vmatpush.msrb.mxu2 %v1294_v63  ;;  %898 = vpow2.f32 %v845_v58 }
  0x4b   :  { %830 = vmatpush.msk.msrb.mxu1 %vm1188_vm4, %v1082_v15  ;;  %417 = vmatmul.f32.vlgmr.msra.gmra.mxu3 %v203_v39  ;;  %900 = vrcp.f32 %v1585_v62 }
  0x4c   :  { %466 = vmatpush.msrb.mxu0 %v1328_v23  ;;  %856 = vmatpush.msrb.mxu2 %v1321_v17  ;;  %v552_v17 = vld [vmem:[#allocation8 + $0x8] sm:$0xff] }
  0x4d   :  { %831 = vmatpush.msk.msrb.mxu1 %vm1202_vm5, %v1082_v15  ;;  %872 = vmatpush.msk.msrb.mxu3 %vm1262_vm8, %v1082_v15  ;;  %v843_v36 = vmul.f32 -1.442695, %v552_v17 }
  0x4e   :  { %470 = vmatpush.msrb.mxu0 %v1343_v31  ;;  %857 = vmatpush.msrb.mxu2 %v1328_v23 }
  0x4f   :  { %832 = vmatpush.msk.msrb.mxu1 %vm1210_vm6, %v1082_v15  ;;  %214 = vmatmul.f32.gmra.mxu0 %v213_v12 }
  0x50   :  { %315 = vmatmul.f32.vlgmr.msra.gmra.mxu1 %v1412_v8  ;;  %474 = vmatpush.msrb.mxu0 %v1374_v46 }
  0x51   :  { %858 = vmatpush.msrb.mxu2 %v1343_v31  ;;  %833 = vmatpush.msk.msrb.mxu1 %vm1230_vm7, %v1082_v15 }
  0x52   :  { %873 = vmatpush.msk.msrb.mxu3 %vm1284_vm9, %v1082_v15  ;;  %478 = vmatpush.msrb.mxu0 %v1386_v54 }
  0x53   :  { %859 = vmatpush.msrb.mxu2 %v1374_v46  ;;  %834 = vmatpush.msk.msrb.mxu1 %vm1262_vm8, %v1082_v15 }
  0x54   :  { %874 = vmatpush.msk.msrb.mxu3 %vm1290_vm10, %v1082_v15  ;;  %378 = vmatmul.f32.gmra.mxu2 %v210_v30 }
  0x55   :  { %482 = vmatpush.msrb.mxu0 %v1398_v0  ;;  %860 = vmatpush.msrb.mxu2 %v1386_v54 }
  0x56   :  { %835 = vmatpush.msk.msrb.mxu1 %vm1284_vm9, %v1082_v15  ;;  %875 = vmatpush.msk.msrb.mxu3 %vm1306_vm11, %v1082_v15  ;;  %vm682_vm9 = vcmp.eq.f32.partialorder %v681_v44, 8.507059e+37 }
  0x57   :  { %423 = vmatmul.f32.gmra.mxu3 %v211_v32  ;;  %486 = vmatpush.msrb.mxu0 %v1409_v7  ;;  %v683_v32 = vand.u32 2147483648, %v1585_v62 }
  0x58   :  { %861 = vmatpush.msrb.mxu2 %v1398_v0  ;;  %836 = vmatpush.msk.msrb.mxu1 %vm1290_vm10, %v1082_v15  ;;  %v161_v0 = vsub.f32 0.0, %v1400_v4 }
  0x59   :  { %876 = vmatpush.msk.msrb.mxu3 %vm1337_vm12, %v1082_v15  ;;  %319 = vmatmul.f32.gmra.mxu1 %v1457_v1 }
  0x5a   :  { %490 = vmatpush.msrb.mxu0 %v1421_v19  ;;  %862 = vmatpush.msrb.mxu2 %v1409_v7  ;;  %v162_v7 = vsub.f32 0.0, %v1446_v42  ;;  %v163_v21 = vmul.f32 1.442695, %v161_v0 }
  0x5b   :  { %492 = vmatmul.f32.vlgmr.msrb.gmra.mxu0 %v1412_v8  ;;  %837 = vmatpush.msk.msrb.mxu1 %vm1306_vm11, %v1082_v15 }
  0x5c   :  { %877 = vmatpush.msk.msrb.mxu3 %vm1346_vm13, %v1082_v15  ;;  %863 = vmatpush.msrb.mxu2 %v1421_v19  ;;  %v165_v27 = vmul.f32 1.442695, %v162_v7 }
  0x5d   :  { %838 = vmatpush.msk.msrb.mxu1 %vm1337_vm12, %v1082_v15  ;;  %496 = vmatmul.f32.vlgmr.msrb.gmra.mxu2 %v1457_v1 }
  0x5e   :  { %878 = vmatpush.msk.msrb.mxu3 %vm1361_vm14, %v1082_v15 }
  0x5f   :  { %839 = vmatpush.msk.msrb.mxu1 %vm1346_vm13, %v1082_v15 }
  0x60   :  { %879 = vmatpush.msk.msrb.mxu3 %vm1367_vm15, %v1082_v15 }
  0x61   :  { %537 = vmatmul.f32.vlgmr.msrb.gmra.mxu3 %v1457_v1  ;;  %840 = vmatpush.msk.msrb.mxu1 %vm1361_vm14, %v1082_v15 }
  0x63   :  { %841 = vmatpush.msk.msrb.mxu1 %vm1367_vm15, %v1082_v15  ;;  %v893_v15 = vpop.eup %892 }
  0x64   :  { %533 = vmatmul.f32.vlgmr.msrb.gmra.mxu1 %v1412_v8  ;;  %v895_v63 = vpop.eup %894  ;;  %v1588_v24 = vadd.f32 1.0, %v893_v15 }
  0x65   :  { %v1590_v31 = vadd.f32 1.0, %v895_v63  ;;  %v897_v41 = vpop.eup %896 }
  0x66   :  { %902 = vrcp.f32 %v1588_v24  ;;  %v899_v46 = vpop.eup %898  ;;  %v1596_v51 = vadd.f32 1.0, %v897_v41  ;;  %v629_v20 = vand.u32 2147483648, %v1588_v24  ;;  %vm623_vm2 = vweird.f32 %v1588_v24 }
  0x67   :  { %904 = vrcp.f32 %v1590_v31  ;;  %v1594_v48 = vpop.eup %900  ;;  %v1600_v56 = vadd.f32 1.0, %v899_v46  ;;  %v627_v58 = vand.u32 2147483647, %v1588_v24  ;;  %vm566_vm4 = vweird.f32 %v1590_v31 }
  0x68   :  { %906 = vpow2.f32 %v843_v36  ;;  %v673_v55 = vmul.f32 %v1594_v48, %v1585_v62  ;;  %vm678_vm1 = vweird.f32 %v1594_v48  ;;  %v570_v17 = vand.u32 2147483647, %v1590_v31 }
  0x69   :  { %908 = vrcp.f32 %v1596_v51  ;;  %vm1645_vm6 = vmor %vm677_vm0, %vm678_vm1  ;;  %vm628_vm10 = vcmp.eq.f32.partialorder %v627_v58, 8.507059e+37  ;;  %vm692_vm12 = vweird.f32 %v1596_v51  ;;  %vm638_vm14 = vweird.f32 %v1600_v56  ;;  %v85_v58 = vld [vmem:[#allocation2 + $0x8] sm:$0xff] }
  0x6a   :  { %v674_v10 = vsub.f32 1.0, %v673_v55  ;;  %910 = vrcp.f32 %v1600_v56  ;;  %vm571_vm11 = vcmp.eq.f32.partialorder %v570_v17, 8.507059e+37 }
  0x6b   :  { %912 = vpow2.f32 %v163_v21  ;;  %v698_v21 = vand.u32 2147483648, %v1596_v51 }
  0x6c   :  { %v1602_v57 = vpop.eup %902  ;;  %v675_v38 = vmul.f32 %v1594_v48, %v674_v10 }
  0x6d   :  { %v1605_v5 = vpop.eup %904  ;;  %v619_v18 = vmul.f32 %v1602_v57, %v1588_v24  ;;  %vm624_vm3 = vweird.f32 %v1602_v57 }
  0x6e   :  { %v907_v6 = vpop.eup %906  ;;  %v562_v4 = vmul.f32 %v1605_v5, %v1590_v31  ;;  %v676_v13 = vadd.f32 %v1594_v48, %v675_v38  ;;  %vm567_vm5 = vweird.f32 %v1605_v5  ;;  %vm1654_vm7 = vmor %vm623_vm2, %vm624_vm3 }
  0x6f   :  { %v1614_v22 = vadd.f32 1.0, %v907_v6  ;;  %v1616_v33 = vpop.eup %908  ;;  %v620_v39 = vsub.f32 1.0, %v619_v18  ;;  %vm1663_vm8 = vmor %vm566_vm4, %vm567_vm5 }
  0x70   :  { %v563_v43 = vsub.f32 1.0, %v562_v4  ;;  %v1619_v45 = vpop.eup %910  ;;  %v688_v11 = vmul.f32 %v1616_v33, %v1596_v51  ;;  %vm693_vm13 = vweird.f32 %v1616_v33  ;;  %v644_v4 = vand.u32 2147483648, %v1600_v56 }
  0x71   :  { %914 = vrcp.f32 %v1614_v22  ;;  %v621_v14 = vmul.f32 %v1602_v57, %v620_v39  ;;  %v634_v28 = vmul.f32 %v1619_v45, %v1600_v56  ;;  %v913_v49 = vpop.eup %912  ;;  %vm639_vm15 = vweird.f32 %v1619_v45  ;;  %vm1688_vm0 = vmor %vm692_vm12, %vm693_vm13 }
  0x72   :  { %916 = vpow2.f32 %v165_v27  ;;  %v564_v26 = vmul.f32 %v1605_v5, %v563_v43  ;;  %v689_v46 = vsub.f32 1.0, %v688_v11  ;;  %v642_v39 = vand.u32 2147483647, %v1600_v56  ;;  %vm1694_vm1 = vmor %vm638_vm14, %vm639_vm15 }
  0x73   :  { %v645_v11 = vor.u32 1.1754944e-38, %v644_v4  ;;  %vm581_vm4 = vweird.f32 %v1614_v22 }
  0x74   :  { %v565_v62 = vadd.f32 %v1605_v5, %v564_v26  ;;  %v690_v7 = vmul.f32 %v1616_v33, %v689_v46  ;;  %vm643_vm3 = vcmp.eq.f32.partialorder %v642_v39, 8.507059e+37  ;;  %v84_v26 = vld [vmem:[#allocation2] sm:$0xff] }
  0x76   :  { %v691_v27 = vadd.f32 %v1616_v33, %v690_v7 }
  0xc2   :  { %v207_v60 = vpop.f32.mrf.mxu0 }
  0xca   :  { %v374_v23 = vpop.f32.mrf.mxu2 }
  0xcc   :  { %v215_v50 = vpop.f32.mrf.mxu0 }
  0xcd   :  { %v316_v3 = vpop.f32.mrf.mxu1 }
  0xce   :  { %v418_v40 = vpop.f32.mrf.mxu3  ;;  %v317_v52 = vadd.f32 %v316_v3, %v207_v60  ;;  %v1639_v60 = vpop.eup %914  ;;  %v622_v3 = vadd.f32 %v1602_v57, %v621_v14 }
  0xcf   :  { %v917_v36 = vpop.eup %916  ;;  %vm582_vm5 = vweird.f32 %v1639_v60 }
  0xd0   :  { %v375_v8 = vadd.f32 %v374_v23, %v317_v52  ;;  %v572_v23 = vand.u32 2147483648, %v1590_v31  ;;  %v167_v52 = vsub.f32 1.0, %v913_v49  ;;  %v626_v0 = vsel %vm1654_vm7, %v1602_v57, %v622_v3 }
  0xd1   :  { %v569_v31 = vsel %vm1663_vm8, %v1605_v5, %v565_v62  ;;  %vm739_vm8 = vcmask 124928  }
  0xd2   :  { %v419_v37 = vadd.f32 %v418_v40, %v375_v8  ;;  %v573_v6 = vor.u32 1.1754944e-38, %v572_v23  ;;  %740 = vst.msk [vmem:[#allocation10 + $0x5] sm:$0x7] %vm739_vm8, %v1083_v16  ;;  %v600_v23 = vadd.s32 4294967288, %v1142_v2 }
  0xd4   :  { %v574_v5 = vsel %vm571_vm11, %v573_v6, %v569_v31 }
  0xd6   :  { %v320_v54 = vpop.f32.mrf.mxu1 }
  0xd7   :  { %v321_v59 = vadd.f32 %v320_v54, %v215_v50  ;;  %v379_v61 = vpop.f32.mrf.mxu2  ;;  %v635_v50 = vsub.f32 1.0, %v634_v28  ;;  %v684_v54 = vor.u32 1.1754944e-38, %v683_v32  ;;  %v699_v32 = vor.u32 1.1754944e-38, %v698_v21 }
  0xd8   :  { %v493_v25 = vpop.f32.mrf.mxu0  ;;  %v587_v28 = vand.u32 2147483648, %v1614_v22 }
  0xd9   :  { %v380_v19 = vadd.f32 %v379_v61, %v321_v59  ;;  %v494_v47 = vadd.f32 %v493_v25, %v419_v37  ;;  %v680_v59 = vsel %vm1645_vm6, %v1594_v48, %v676_v13  ;;  %v630_v61 = vor.u32 1.1754944e-38, %v629_v20  ;;  %vm583_vm6 = vmor %vm581_vm4, %vm582_vm5 }
  0xda   :  { %v424_v9 = vpop.f32.mrf.mxu3  ;;  %v636_v8 = vmul.f32 %v1619_v45, %v635_v50  ;;  %v577_v48 = vmul.f32 %v1639_v60, %v1614_v22  ;;  %v685_v57 = vsel %vm682_vm9, %v684_v54, %v680_v59  ;;  %v588_v49 = vor.u32 1.1754944e-38, %v587_v28 }
  0xdb   :  { %v425_v42 = vadd.f32 %v424_v9, %v380_v19  ;;  %v168_v9 = vsub.f32 1.0, %v917_v36  ;;  %v631_v10 = vsel %vm628_vm10, %v630_v61, %v626_v0  ;;  %v696_v19 = vand.u32 2147483647, %v1596_v51 }
  0xdc   :  { %v637_v38 = vadd.f32 %v1619_v45, %v636_v8  ;;  %v578_v43 = vsub.f32 1.0, %v577_v48  ;;  %vm602_vm9 = vcmask 130112   ;;  %vm605_vm10 = vcmask 122880  }
  0xdd   :  { %vm697_vm2 = vcmp.eq.f32.partialorder %v696_v19, 8.507059e+37 }
  0xde   :  { %v641_v56 = vsel %vm1694_vm1, %v1619_v45, %v637_v38  ;;  %v579_v13 = vmul.f32 %v1639_v60, %v578_v43 }
  0xdf   :  { %v646_v20 = vsel %vm643_vm3, %v645_v11, %v641_v56 }
  0xe0   :  { %v497_v1 = vpop.f32.mrf.mxu2 }
  0xe1   :  { %v498_v29 = vadd.f32 %v497_v1, %v425_v42  ;;  %v534_v30 = vpop.f32.mrf.mxu1 }
  0xe2   :  { %v535_v12 = vadd.f32 %v534_v30, %v494_v47 }
  0xe4   :  { %v541_v34 = vsub.f32 0.0, %v535_v12  ;;  %v538_v35 = vpop.f32.mrf.mxu3  ;;  %v695_v12 = vsel %vm1688_vm0, %v1616_v33, %v691_v27  ;;  %v580_v33 = vadd.f32 %v1639_v60, %v579_v13 }
  0xe5   :  { %v539_v53 = vadd.f32 %v538_v35, %v498_v29  ;;  %v700_v14 = vsel %vm697_vm2, %v699_v32, %v695_v12 }
  0xe6   :  { %v543_v15 = vmul.f32 1.442695, %v541_v34  ;;  %v585_v34 = vand.u32 2147483647, %v1614_v22 }
  0xe7   :  { %v542_v40 = vsub.f32 0.0, %v539_v53  ;;  %v584_v53 = vsel %vm583_vm6, %v1639_v60, %v580_v33 }
  0xe8   :  { %918 = vpow2.f32 %v543_v15  ;;  %vm586_vm7 = vcmp.eq.f32.partialorder %v585_v34, 8.507059e+37 }
  0xe9   :  { %v545_v24 = vmul.f32 1.442695, %v542_v40  ;;  %v589_v15 = vsel %vm586_vm7, %v588_v49, %v584_v53 }
  0xeb   :  { %920 = vpow2.f32 %v545_v24 }
  0xee   :  { %v919_v18 = vpop.eup %918 }
  0xef   :  { %v547_v25 = vmul.f32 %v919_v18, %v167_v52 }
  0xf1   :  { %v921_v47 = vpop.eup %920  ;;  %549 = vst [vmem:[#allocation11] sm:$0xff] %v547_v25  ;;  %v702_v51 = vmul.f32 %v685_v57, %v547_v25  ;;  %v648_v1 = vmul.f32 %v631_v10, %v547_v25  ;;  %v591_v29 = vmul.f32 %v574_v5, %v547_v25  ;;  %v715_v44 = vmul.f32 %v547_v25, %v84_v26 }
  0xf2   :  { %v548_v30 = vmul.f32 %v921_v47, %v168_v9 }
  0xf3   :  { %704 = vadd.xlane.f32.xlu2 %v702_v51  ;;  %650 = vadd.xlane.f32.xlu1 %v648_v1 }
  0xf4   :  { %550 = vst [vmem:[#allocation11 + $0x8] sm:$0xff] %v548_v30  ;;  %593 = vadd.xlane.f32.xlu0 %v591_v29  ;;  %v703_v35 = vmul.f32 %v700_v14, %v548_v30  ;;  %v649_v45 = vmul.f32 %v646_v20, %v548_v30  ;;  %v716_v63 = vmul.f32 %v548_v30, %v85_v58 }
  0xf5   :  { %v592_v3 = vmul.f32 %v589_v15, %v548_v30  ;;  %764 = dma.vmem_to_hbm [thread:$0]  %s757_s12, 256, %s759_s15, [#allocation12], %s1077_s26, %s1077_s26, %s1078_s27  }
  0xfb   :  { %706 = vadd.xlane.f32.xlu2 %v703_v35  ;;  %652 = vadd.xlane.f32.xlu1 %v649_v45 }
  0xfc   :  { %717 = vadd.xlane.f32.xlu0 %v715_v44 }
 0x103   :  { %728 = vadd.xlane.f32.xlu2 %v547_v25  ;;  %719 = vadd.xlane.f32.xlu1 %v716_v63 }
 0x104   :  { %595 = vadd.xlane.f32.xlu0 %v592_v3 }
 0x10c   :  { %730 = vadd.xlane.f32.xlu0 %v548_v30 }
 0x166   :  { %v705_v22 = vpop.xlane.xlu2 %704  ;;  %v651_v60 = vpop.xlane.xlu1 %650 }
 0x167   :  { %v594_v17 = vpop.xlane.xlu0 %593  ;;  %v710_v41 = vperm.slane %v705_v22, %v1142_v2  ;;  %v656_v62 = vperm.slane %v651_v60, %v1142_v2 }
 0x168   :  { %v599_v0 = vperm.slane %v594_v17, %v1142_v2 }
 0x16e   :  { %v707_v36 = vpop.xlane.xlu2 %706  ;;  %v653_v40 = vpop.xlane.xlu1 %652 }
 0x16f   :  { %v711_v46 = vperm.slane %v707_v36, %v600_v23  ;;  %v657_v50 = vperm.slane %v653_v40, %v600_v23  ;;  %v718_v52 = vpop.xlane.xlu0 %717 }
 0x170   :  { %v723_v24 = vperm.slane %v718_v52, %v1142_v2 }
 0x171   :  { %v712_v54 = vsel %vm602_vm9, %v711_v46, %v710_v41  ;;  %v658_v16 = vsel %vm602_vm9, %v657_v50, %v656_v62 }
 0x172   :  { %714 = vst.msk [vmem:[#allocation10 + $0x2] sm:$0x1] %vm605_vm10, %v712_v54 }
 0x173   :  { %660 = vst.msk [vmem:[#allocation10 + $0x1] sm:$0x1] %vm605_vm10, %v658_v16 }
 0x176   :  { %v720_v55 = vpop.xlane.xlu1 %719  ;;  %v729_v8 = vpop.xlane.xlu2 %728 }
 0x177   :  { %v724_v59 = vperm.slane %v720_v55, %v600_v23  ;;  %v596_v61 = vpop.xlane.xlu0 %595  ;;  %v734_v48 = vperm.slane %v729_v8, %v1142_v2 }
 0x178   :  { %v601_v6 = vperm.slane %v596_v61, %v600_v23 }
 0x179   :  { %v725_v31 = vsel %vm602_vm9, %v724_v59, %v723_v24 }
 0x17a   :  { %727 = vst.msk [vmem:[#allocation10 + $0x3] sm:$0x1] %vm605_vm10, %v725_v31  ;;  %v603_v7 = vsel %vm602_vm9, %v601_v6, %v599_v0 }
 0x17b   :  { %606 = vst.msk [vmem:[#allocation10] sm:$0x1] %vm605_vm10, %v603_v7 }
 0x17f   :  { %v731_v9 = vpop.xlane.xlu0 %730 }
 0x180   :  { %v735_v57 = vperm.slane %v731_v9, %v600_v23 }
 0x182   :  { %v736_v10 = vsel %vm602_vm9, %v735_v57, %v734_v48 }
 0x183   :  { %738 = vst.msk [vmem:[#allocation10 + $0x4] sm:$0x1] %vm605_vm10, %v736_v10 }
 0x184   :  { %751 = dma.vmem_to_hbm [thread:$0]  %s747_s16, 128, %s749_s19, [#allocation4]  }
 0x185   :  { %1072 = dma.done.wait [#allocation4], 128  }
 0x186   :  { %1073 = vsyncadd [#allocation4], 4294967168 }
 0x187   :  { %1074 = dma.done.wait [#allocation12], 256  }
 0x188   :  { %1075 = vsyncadd [#allocation12], 4294967040 }
 0x189   :  { %773 = vsyncpa [#allocation3], 1 }
 0x18a   :  { %774 = vsyncpa [#allocation6], 1 }
 0x18b   :  { %775 = vsyncpa [#allocation9], 1 }
 0x18c   :  { %776 = vsyncpa [#allocation4], 1 }
 0x18d   :  { %777 = vsyncpa [#allocation12], 1 }

</bundles_post_ra>
